<compile_context>
chip_gen: v5e
topology: v5e:2x2
jax: 0.10.0
libtpu: 0.0.40
codegen_flags: <defaults>
</compile_context>

<pallas_src>
import functools

import jax
import jax.numpy as jnp
from jax.experimental import pallas as pl
from jax.experimental.pallas import tpu as pltpu


def _round_up(x, m):
    return ((x + m - 1) // m) * m


def _cdiv(a, b):
    return (a + b - 1) // b


# ---------------------------------------------------------------------------
# In-kernel helpers (all f32, per-tile)
# ---------------------------------------------------------------------------
def _valid_rows(tn, n_rows):
    """(tn, 1) bool mask: True for rows that are real batch rows (< n_rows)."""
    row0 = pl.program_id(0) * tn
    row_ids = row0 + jax.lax.broadcasted_iota(jnp.int32, (tn, 1), 0)
    return row_ids < n_rows


def _row_logsumexp(x):
    m = jnp.max(x, axis=1, keepdims=True)
    return m + jnp.log(jnp.sum(jnp.exp(x - m), axis=1, keepdims=True))


def _ce_partial(x, labels, valid):
    """Masked per-tile sum of hard-label CE. x:(tn,C) f32, labels:(tn,1) i32."""
    tn, c = x.shape
    lse = _row_logsumexp(x)
    col = jax.lax.broadcasted_iota(jnp.int32, (tn, c), 1)
    picked = jnp.sum(jnp.where(col == labels, x, 0.0), axis=1, keepdims=True)
    return jnp.sum(jnp.where(valid, lse - picked, 0.0))


def _soft_ce_partial(x, t, valid):
    """Masked per-tile sum of soft CE: sum_c -t*(x-lse) = lse*sum(t) - sum(t*x)."""
    lse = _row_logsumexp(x)
    st = jnp.sum(t, axis=1, keepdims=True)
    stx = jnp.sum(t * x, axis=1, keepdims=True)
    return jnp.sum(jnp.where(valid, lse * st - stx, 0.0))


# ---------------------------------------------------------------------------
# Kernel bodies (one (8,128) lane-dense partial-sum block per grid step)
# ---------------------------------------------------------------------------
def _mixco_kernel(logits_ref, labels_ref, mlogits_ref, mtgt_ref,
                  ce_ref, soft_ref, *, n_rows):
    tn = logits_ref.shape[0]
    valid = _valid_rows(tn, n_rows)
    ce = _ce_partial(logits_ref[...].astype(jnp.float32), labels_ref[...], valid)
    soft = _soft_ce_partial(mlogits_ref[...].astype(jnp.float32),
                            mtgt_ref[...].astype(jnp.float32), valid)
    ce_ref[...] = jnp.full(ce_ref.shape, ce, dtype=jnp.float32)
    soft_ref[...] = jnp.full(soft_ref.shape, soft, dtype=jnp.float32)


def _ce_kernel(logits_ref, labels_ref, ce_ref, *, n_rows):
    tn = logits_ref.shape[0]
    valid = _valid_rows(tn, n_rows)
    ce = _ce_partial(logits_ref[...].astype(jnp.float32), labels_ref[...], valid)
    ce_ref[...] = jnp.full(ce_ref.shape, ce, dtype=jnp.float32)


# ---------------------------------------------------------------------------
# Tiling plan (per-generation VMEM budget, temporaries accounted for)
# ---------------------------------------------------------------------------
def _vmem_capacity_bytes():
    try:
        info = pltpu.get_tpu_info()
        cap = getattr(info, "vmem_capacity_bytes", None)
        if cap:
            return int(cap)
    except Exception:
        pass
    return 64 * 1024 * 1024  # conservative default (v7x per-TC VMEM)


def _plan(n, c, num_big_inputs, big_dtype_bytes):
    vmem_cap = _vmem_capacity_bytes()
    big_vmem = vmem_cap >= 100 * 1024 * 1024           # v5e / v6e (128 MiB)
    budget = min(48 << 20, max(16 << 20, vmem_cap // 3))
    tn_cap = 1024 if big_vmem else 512

    # Per-batch-row VMEM bytes: double-buffered input tile (HBM dtype) plus
    # ~3 f32-sized in-kernel temporaries (cast, exp(x-m), where/product) per
    # big (N, C) operand.
    row_bytes = max(1, num_big_inputs * c * (2 * big_dtype_bytes + 3 * 4))

    if n < 8:
        tn = n                        # block spans the full (sub-8) batch dim
    else:
        tn = (budget // row_bytes) // 8 * 8
        tn = max(8, min(tn_cap, tn))
        if n >= 16:                   # keep >= 2 tiles so both v7x TCs get work
            tn = min(tn, _round_up(_cdiv(n, 2), 8))
        tn = min(tn, _round_up(n, 8))
    grid = _cdiv(n, tn)

    est = row_bytes * tn + 4 * (8 * 128 * 4)           # + double-buffered outs
    vmem_limit = int(min(int(vmem_cap * 0.9), max(32 << 20, 2 * est)))
    return tn, grid, vmem_limit


# ---------------------------------------------------------------------------
# pallas_call wrappers
# ---------------------------------------------------------------------------
def _mixco_fused(logits, labels, logits_mix, lbls_mix):
    n, c = logits.shape
    big_bytes = max(jnp.dtype(logits.dtype).itemsize,
                    jnp.dtype(logits_mix.dtype).itemsize,
                    jnp.dtype(lbls_mix.dtype).itemsize)
    tn, grid, vmem_limit = _plan(n, c, num_big_inputs=3, big_dtype_bytes=big_bytes)

    lab = labels.astype(jnp.int32).reshape(n, 1)

    row_spec = pl.BlockSpec((tn, c), lambda i: (i, 0))     # full-dim class axis
    lab_spec = pl.BlockSpec((tn, 1), lambda i: (i, 0))
    out_spec = pl.BlockSpec((8, 128), lambda i: (i, 0))    # lane-dense partials

    kernel = functools.partial(_mixco_kernel, n_rows=n)
    ce_out, soft_out = pl.pallas_call(
        kernel,
        out_shape=(jax.ShapeDtypeStruct((grid * 8, 128), jnp.float32),
                   jax.ShapeDtypeStruct((grid * 8, 128), jnp.float32)),
        grid=(grid,),
        in_specs=[row_spec, lab_spec, row_spec, row_spec],
        out_specs=(out_spec, out_spec),
        compiler_params=pltpu.CompilerParams(
            dimension_semantics=("parallel",),
            vmem_limit_bytes=vmem_limit),
    )(logits, lab, logits_mix, lbls_mix)

    inv_n = 1.0 / n
    ce = jnp.sum(ce_out.reshape(grid, 8, 128)[:, 0, 0]) * inv_n
    soft = jnp.sum(soft_out.reshape(grid, 8, 128)[:, 0, 0]) * inv_n
    return ce, soft


def _cross_entropy(logits, labels):
    n, c = logits.shape
    tn, grid, vmem_limit = _plan(
        n, c, num_big_inputs=1,
        big_dtype_bytes=jnp.dtype(logits.dtype).itemsize)

    lab = labels.astype(jnp.int32).reshape(n, 1)
    kernel = functools.partial(_ce_kernel, n_rows=n)
    ce_out = pl.pallas_call(
        kernel,
        out_shape=jax.ShapeDtypeStruct((grid * 8, 128), jnp.float32),
        grid=(grid,),
        in_specs=[pl.BlockSpec((tn, c), lambda i: (i, 0)),
                  pl.BlockSpec((tn, 1), lambda i: (i, 0))],
        out_specs=pl.BlockSpec((8, 128), lambda i: (i, 0)),
        compiler_params=pltpu.CompilerParams(
            dimension_semantics=("parallel",),
            vmem_limit_bytes=vmem_limit),
    )(logits, lab)
    return jnp.sum(ce_out.reshape(grid, 8, 128)[:, 0, 0]) / n


def mixco_loss(outputs, mix_param):
    """Pallas equivalent of MixcoLoss(mix_param).forward(outputs)."""
    is_static_number = isinstance(mix_param, (bool, int, float))
    if (is_static_number and not mix_param) or len(outputs) == 2:
        logits, labels = outputs[0], outputs[1]
        return _cross_entropy(logits, labels)
    logits, labels, logits_mix, lbls_mix = outputs
    ce, soft = _mixco_fused(logits, labels, logits_mix, lbls_mix)
    return ce + mix_param * soft


if __name__ == "__main__":
    # Small, deterministic example shapes: batch N=8, classes C=32.
    N, C = 8, 32
    mix_param = 0.5

    key = jax.random.PRNGKey(0)
    k1, k2, k3, k4 = jax.random.split(key, 4)
    logits = jax.random.normal(k1, (N, C), dtype=jnp.float32)
    labels = jax.random.randint(k2, (N,), 0, C, dtype=jnp.int32)
    logits_mix = jax.random.normal(k3, (N, C), dtype=jnp.float32)
    # Soft targets: non-negative, rows sum to 1 (typical mixup soft labels).
    t_raw = jax.random.uniform(k4, (N, C), dtype=jnp.float32)
    lbls_mix = t_raw / jnp.sum(t_raw, axis=1, keepdims=True)

    loss = mixco_loss((logits, labels, logits_mix, lbls_mix), mix_param)
    loss = jax.block_until_ready(loss)

    # Pure-JAX reference check.
    lse = jax.nn.logsumexp(logits, axis=1)
    ref_ce = jnp.mean(lse - logits[jnp.arange(N), labels])
    ref_soft = jnp.mean(
        jnp.sum(-lbls_mix * jax.nn.log_softmax(logits_mix, axis=1), axis=1))
    ref = ref_ce + mix_param * ref_soft
    assert jnp.allclose(loss, ref, rtol=1e-5, atol=1e-5), (loss, ref)

    # Also exercise the no-mix path.
    loss_nomix = jax.block_until_ready(mixco_loss((logits, labels), 0.0))
    assert jnp.allclose(loss_nomix, ref_ce, rtol=1e-5, atol=1e-5), (loss_nomix, ref_ce)

    print("KERNEL_OK")
</pallas_src>

<mosaic_0001>
module attributes {stable_mosaic.version = 11 : i64} {
  func.func @_mixco_kernel(%arg0: i32, %arg1: memref<8x32xf32, #tpu.memory_space<vmem>>, %arg2: memref<8x1xi32, #tpu.memory_space<vmem>>, %arg3: memref<8x32xf32, #tpu.memory_space<vmem>>, %arg4: memref<8x32xf32, #tpu.memory_space<vmem>>, %arg5: memref<8x128xf32, #tpu.memory_space<vmem>>, %arg6: memref<8x128xf32, #tpu.memory_space<vmem>>) attributes {dimension_semantics = [#tpu.dimension_semantics<parallel>], iteration_bounds = array<i64: 1>, scalar_prefetch = 0 : i64, scratch_operands = 0 : i64, tpu.core_type = #tpu.core_type<tc>, window_params = [{transform_indices = @transform_0, window_bounds = array<i64: 8, 32>}, {transform_indices = @transform_1, window_bounds = array<i64: 8, 1>}, {transform_indices = @transform_2, window_bounds = array<i64: 8, 32>}, {transform_indices = @transform_3, window_bounds = array<i64: 8, 32>}, {transform_indices = @transform_4, window_bounds = array<i64: 8, 128>}, {transform_indices = @transform_5, window_bounds = array<i64: 8, 128>}]} {
    %c8_i32 = arith.constant 8 : i32
    %0 = arith.muli %arg0, %c8_i32 : i32
    %1 = tpu.iota {dimensions = array<i32: 0>} : vector<8x1xi32>
    %2 = vector.broadcast %0 : i32 to vector<8x1xi32>
    %3 = arith.addi %2, %1 : vector<8x1xi32>
    %c8_i32_0 = arith.constant 8 : i32
    %4 = vector.broadcast %c8_i32_0 : i32 to vector<8x1xi32>
    %5 = arith.cmpi slt, %3, %4 : vector<8x1xi32>
    %c0 = arith.constant 0 : index
    %c0_1 = arith.constant 0 : index
    %6 = vector.load %arg1[%c0, %c0_1] : memref<8x32xf32, #tpu.memory_space<vmem>>, vector<8x32xf32>
    %c0_2 = arith.constant 0 : index
    %c0_3 = arith.constant 0 : index
    %7 = vector.load %arg2[%c0_2, %c0_3] : memref<8x1xi32, #tpu.memory_space<vmem>>, vector<8x1xi32>
    %cst = arith.constant dense<0xFF800000> : vector<8xf32>
    %8 = vector.multi_reduction <maximumf>, %6, %cst [1] : vector<8x32xf32> to vector<8xf32>
    %9 = vector.shape_cast %8 : vector<8xf32> to vector<8x1xf32>
    %10 = vector.broadcast %9 : vector<8x1xf32> to vector<8x32xf32>
    %11 = arith.subf %6, %10 : vector<8x32xf32>
    %12 = math.exp %11 : vector<8x32xf32>
    %cst_4 = arith.constant dense<0.000000e+00> : vector<8xf32>
    %13 = vector.multi_reduction <add>, %12, %cst_4 [1] : vector<8x32xf32> to vector<8xf32>
    %14 = vector.shape_cast %13 : vector<8xf32> to vector<8x1xf32>
    %15 = math.log %14 : vector<8x1xf32>
    %16 = arith.addf %9, %15 : vector<8x1xf32>
    %17 = tpu.iota {dimensions = array<i32: 1>} : vector<8x32xi32>
    %18 = vector.broadcast %7 : vector<8x1xi32> to vector<8x32xi32>
    %19 = arith.cmpi eq, %17, %18 : vector<8x32xi32>
    %cst_5 = arith.constant 0.000000e+00 : f32
    %20 = vector.broadcast %cst_5 : f32 to vector<8x32xf32>
    %21 = arith.select %19, %6, %20 : vector<8x32xi1>, vector<8x32xf32>
    %cst_6 = arith.constant dense<0.000000e+00> : vector<8xf32>
    %22 = vector.multi_reduction <add>, %21, %cst_6 [1] : vector<8x32xf32> to vector<8xf32>
    %23 = vector.shape_cast %22 : vector<8xf32> to vector<8x1xf32>
    %24 = arith.subf %16, %23 : vector<8x1xf32>
    %cst_7 = arith.constant 0.000000e+00 : f32
    %25 = vector.broadcast %cst_7 : f32 to vector<8x1xf32>
    %26 = arith.select %5, %24, %25 : vector<8x1xi1>, vector<8x1xf32>
    %27 = vector.shape_cast %26 : vector<8x1xf32> to vector<1x8x1xf32>
    %cst_8 = arith.constant dense<0.000000e+00> : vector<1xf32>
    %28 = vector.multi_reduction <add>, %27, %cst_8 [1, 2] : vector<1x8x1xf32> to vector<1xf32>
    %29 = vector.shape_cast %28 : vector<1xf32> to vector<1x1x1xf32>
    %30 = vector.extract %29[0, 0, 0] : f32 from vector<1x1x1xf32>
    %c0_9 = arith.constant 0 : index
    %c0_10 = arith.constant 0 : index
    %31 = vector.load %arg3[%c0_9, %c0_10] : memref<8x32xf32, #tpu.memory_space<vmem>>, vector<8x32xf32>
    %c0_11 = arith.constant 0 : index
    %c0_12 = arith.constant 0 : index
    %32 = vector.load %arg4[%c0_11, %c0_12] : memref<8x32xf32, #tpu.memory_space<vmem>>, vector<8x32xf32>
    %cst_13 = arith.constant dense<0xFF800000> : vector<8xf32>
    %33 = vector.multi_reduction <maximumf>, %31, %cst_13 [1] : vector<8x32xf32> to vector<8xf32>
    %34 = vector.shape_cast %33 : vector<8xf32> to vector<8x1xf32>
    %35 = vector.broadcast %34 : vector<8x1xf32> to vector<8x32xf32>
    %36 = arith.subf %31, %35 : vector<8x32xf32>
    %37 = math.exp %36 : vector<8x32xf32>
    %cst_14 = arith.constant dense<0.000000e+00> : vector<8xf32>
    %38 = vector.multi_reduction <add>, %37, %cst_14 [1] : vector<8x32xf32> to vector<8xf32>
    %39 = vector.shape_cast %38 : vector<8xf32> to vector<8x1xf32>
    %40 = math.log %39 : vector<8x1xf32>
    %41 = arith.addf %34, %40 : vector<8x1xf32>
    %cst_15 = arith.constant dense<0.000000e+00> : vector<8xf32>
    %42 = vector.multi_reduction <add>, %32, %cst_15 [1] : vector<8x32xf32> to vector<8xf32>
    %43 = vector.shape_cast %42 : vector<8xf32> to vector<8x1xf32>
    %44 = arith.mulf %32, %31 : vector<8x32xf32>
    %cst_16 = arith.constant dense<0.000000e+00> : vector<8xf32>
    %45 = vector.multi_reduction <add>, %44, %cst_16 [1] : vector<8x32xf32> to vector<8xf32>
    %46 = vector.shape_cast %45 : vector<8xf32> to vector<8x1xf32>
    %47 = arith.mulf %41, %43 : vector<8x1xf32>
    %48 = arith.subf %47, %46 : vector<8x1xf32>
    %cst_17 = arith.constant 0.000000e+00 : f32
    %49 = vector.broadcast %cst_17 : f32 to vector<8x1xf32>
    %50 = arith.select %5, %48, %49 : vector<8x1xi1>, vector<8x1xf32>
    %51 = vector.shape_cast %50 : vector<8x1xf32> to vector<1x8x1xf32>
    %cst_18 = arith.constant dense<0.000000e+00> : vector<1xf32>
    %52 = vector.multi_reduction <add>, %51, %cst_18 [1, 2] : vector<1x8x1xf32> to vector<1xf32>
    %53 = vector.shape_cast %52 : vector<1xf32> to vector<1x1x1xf32>
    %54 = vector.extract %53[0, 0, 0] : f32 from vector<1x1x1xf32>
    %55 = vector.broadcast %30 : f32 to vector<8x128xf32>
    %c0_19 = arith.constant 0 : index
    %c0_20 = arith.constant 0 : index
    %56 = vector.load %arg5[%c0_19, %c0_20] : memref<8x128xf32, #tpu.memory_space<vmem>>, vector<8x128xf32>
    tpu.vector_store %arg5[%c0_19, %c0_20], %55 {strides = array<i32>} : memref<8x128xf32, #tpu.memory_space<vmem>>, vector<8x128xf32>,
    %57 = vector.broadcast %54 : f32 to vector<8x128xf32>
    %c0_21 = arith.constant 0 : index
    %c0_22 = arith.constant 0 : index
    %58 = vector.load %arg6[%c0_21, %c0_22] : memref<8x128xf32, #tpu.memory_space<vmem>>, vector<8x128xf32>
    tpu.vector_store %arg6[%c0_21, %c0_22], %57 {strides = array<i32>} : memref<8x128xf32, #tpu.memory_space<vmem>>, vector<8x128xf32>,
    return
  }
  func.func @transform_0(%arg0: i32) -> (i32, i32) {
    %c0_i32 = arith.constant 0 : i32
    %c0_i32_0 = arith.constant 0 : i32
    return %arg0, %c0_i32 : i32, i32
  }
  func.func @transform_1(%arg0: i32) -> (i32, i32) {
    %c0_i32 = arith.constant 0 : i32
    %c0_i32_0 = arith.constant 0 : i32
    return %arg0, %c0_i32 : i32, i32
  }
  func.func @transform_2(%arg0: i32) -> (i32, i32) {
    %c0_i32 = arith.constant 0 : i32
    %c0_i32_0 = arith.constant 0 : i32
    return %arg0, %c0_i32 : i32, i32
  }
  func.func @transform_3(%arg0: i32) -> (i32, i32) {
    %c0_i32 = arith.constant 0 : i32
    %c0_i32_0 = arith.constant 0 : i32
    return %arg0, %c0_i32 : i32, i32
  }
  func.func @transform_4(%arg0: i32) -> (i32, i32) {
    %c0_i32 = arith.constant 0 : i32
    %c0_i32_0 = arith.constant 0 : i32
    return %arg0, %c0_i32 : i32, i32
  }
  func.func @transform_5(%arg0: i32) -> (i32, i32) {
    %c0_i32 = arith.constant 0 : i32
    %c0_i32_0 = arith.constant 0 : i32
    return %arg0, %c0_i32 : i32, i32
  }
}

</mosaic_0001>

<bundles_post_ra>
// kernel: tpu_custom_call.1
= control target key start
LH: loop header
LB: loop body
LE: loop exit
PB: predicated region body
PF: predicated region fallthrough
CT: control target
= control target key end

     0   :  { %11 = vsyncpa [#allocation3], 0  ;;  %s348_s0 = inlined_call_operand.vmem [shape: f32[8,32], index: 0, kind: input, shape index: {}]   ;;  %s349_s1 = inlined_call_operand.vmem [shape: s32[8,1], index: 1, kind: input, shape index: {}]   ;;  %s350_s2 = inlined_call_operand.hbm [shape: f32[8,32], index: 2, kind: input, shape index: {}]   ;;  %s351_s3 = inlined_call_operand.hbm [shape: f32[8,32], index: 3, kind: input, shape index: {}]   ;;  %s352_s4 = inlined_call_operand.hbm [shape: f32[8,128], index: 4, kind: output, shape index: {0}]   ;;  %s353_s5 = inlined_call_operand.hbm [shape: f32[8,128], index: 5, kind: output, shape index: {1}]  }
   0x1   :  { %12 = vsyncpa [#allocation6], 0 }
   0x2   :  { %13 = vsyncpa [#allocation4], 0 }
   0x3   :  { %14 = vsyncpa [#allocation9], 0  ;;  %s24_s20 = sshll.u32 %s350_s2, 4  ;;  %s288_s21 = smov [#allocation2]   ;;  %s25_s20 = int_to_ptr.hbm [resolvable:$true] %s24_s20 }
   0x4   :  { %s26_s22 = sshll.u32 %s288_s21, 4  ;;  %s35_s25 = sshll.u32 %s351_s3, 4  ;;  %s27_s22 = int_to_ptr.vmem [resolvable:$true] %s26_s22  ;;  %s36_s25 = int_to_ptr.hbm [resolvable:$true] %s35_s25 }
   0x5   :  { %29 = dma.hbm_to_vmem [thread:$0]  %s25_s20, 128, %s27_s22, [#allocation3]  }
   0x6   :  { %s289_s26 = smov [#allocation5]  }
   0x7   :  { %s37_s27 = sshll.u32 %s289_s26, 4  ;;  %s38_s27 = int_to_ptr.vmem [resolvable:$true] %s37_s27 }
   0x8   :  { %40 = dma.hbm_to_vmem [thread:$0]  %s36_s25, 128, %s38_s27, [#allocation6]  }
   0x9   :  { %280 = dma.done.wait [#allocation3], 128  }
   0xa   :  { %281 = vsyncadd [#allocation3], 4294967168 }
   0xb   :  { %282 = dma.done.wait [#allocation6], 128  }
   0xc   :  { %283 = vsyncadd [#allocation6], 4294967168  ;;  %v290_v0 = vmov 0   ;;  %vm57_vm0 = vcmask 261120   ;;  %v93_v1 = vld [vmem:[#allocation2] sm:$0xff]  ;;  %v70_v6 = vlaneseq  ;;  %v94_v21 = vld [vmem:[#allocation5] sm:$0xff] }
   0xd   :  { %174 = vset.pattern.permute.xlu1 %v290_v0  ;;  %175 = vset.pattern.permute.xlu0 %v290_v0  ;;  %v56_v2 = vld [vmem:[%s349_s1] sm:$0xff]  ;;  %v95_v3 = vsel %vm57_vm0, %v93_v1, -inf  ;;  %v107_v22 = vsel %vm57_vm0, %v94_v21, 0.0  ;;  %v110_v23 = vmul.f32 %v94_v21, %v93_v1  ;;  %vm82_vm2 = vcmask 7168   ;;  %s138_s7 = sshll.u32 %s352_s4, 4  ;;  %s292_s9 = smov [#allocation8]   ;;  %s139_s7 = int_to_ptr.hbm [resolvable:$true] %s138_s7 }
   0xe   :  { %73 = vperm.xlu1 %174, %v56_v2   ;;  %96 = vmax.xlane.f32.xlu0 %v95_v3  ;;  %v55_v4 = vld [vmem:[%s348_s0] sm:$0xff]  ;;  %v71_v7 = vand.u32 127, %v70_v6  ;;  %s291_s0 = smov [#allocation7]   ;;  %s147_s10 = sshll.u32 %s292_s9, 4  ;;  %s148_s10 = int_to_ptr.vmem [resolvable:$true] %s147_s10 }
   0xf   :  { %v58_v5 = vsel %vm57_vm0, %v55_v4, -inf  ;;  %v111_v24 = vsel %vm57_vm0, %v110_v23, 0.0  ;;  %s136_s1 = sshll.u32 %s291_s0, 4  ;;  %s149_s13 = sshll.u32 %s353_s5, 4  ;;  %s137_s1 = int_to_ptr.vmem [resolvable:$true] %s136_s1  ;;  %s150_s13 = int_to_ptr.hbm [resolvable:$true] %s149_s13 }
  0x16   :  { %59 = vmax.xlane.f32.xlu0 %v58_v5 }
  0x80   :  { %v74_v8 = vpop.permute.xlu1 %73 }
  0x81   :  { %vm75_vm1 = vcmp.eq.s32.totalorder %v71_v7, %v74_v8  ;;  %v97_v9 = vpop.xlane.xlu0 %96 }
  0x82   :  { %v76_v10 = vsel %vm75_vm1, %v55_v4, 0.0  ;;  %v98_v11 = vsub.f32 %v93_v1, %v97_v9 }
  0x83   :  { %v77_v12 = vsel %vm57_vm0, %v76_v10, 0.0 }
  0x84   :  { %78 = vadd.xlane.f32.xlu0 %v77_v12  ;;  %v99_v13 = vmul.f32 1.442695, %v98_v11 }
  0x86   :  { %176 = vpow2.f32 %v99_v13 }
  0x89   :  { %v60_v14 = vpop.xlane.xlu0 %59 }
  0x8a   :  { %v61_v15 = vsub.f32 %v55_v4, %v60_v14 }
  0x8c   :  { %v177_v16 = vpop.eup %176  ;;  %v62_v17 = vmul.f32 1.442695, %v61_v15 }
  0x8d   :  { %v101_v18 = vsel %vm57_vm0, %v177_v16, 0.0 }
  0x8e   :  { %178 = vpow2.f32 %v62_v17  ;;  %102 = vadd.xlane.f32.xlu1 %v101_v18 }
  0x94   :  { %v179_v19 = vpop.eup %178 }
  0x95   :  { %v64_v20 = vsel %vm57_vm0, %v179_v19, 0.0 }
  0x96   :  { %65 = vadd.xlane.f32.xlu2 %v64_v20 }
  0x9e   :  { %108 = vadd.xlane.f32.xlu2 %v107_v22 }
  0xa6   :  { %112 = vadd.xlane.f32.xlu2 %v111_v24 }
  0xf7   :  { %v79_v32 = vpop.xlane.xlu0 %78 }
 0x101   :  { %v103_v25 = vpop.xlane.xlu1 %102 }
 0x102   :  { %180 = vlog2.f32 %v103_v25 }
 0x108   :  { %v181_v27 = vpop.eup %180 }
 0x109   :  { %v66_v26 = vpop.xlane.xlu2 %65  ;;  %v105_v31 = vmul.f32 0.6931472, %v181_v27 }
 0x10a   :  { %182 = vlog2.f32 %v66_v26 }
 0x10b   :  { %v106_v35 = vadd.f32 %v105_v31, %v97_v9 }
 0x110   :  { %v183_v28 = vpop.eup %182 }
 0x111   :  { %v68_v29 = vmul.f32 0.6931472, %v183_v28  ;;  %v109_v30 = vpop.xlane.xlu2 %108 }
 0x112   :  { %v114_v37 = vmul.f32 %v109_v30, %v106_v35 }
 0x113   :  { %v69_v33 = vadd.f32 %v68_v29, %v60_v14 }
 0x115   :  { %v80_v34 = vsub.f32 %v69_v33, %v79_v32 }
 0x117   :  { %v83_v36 = vsel %vm82_vm2, %v80_v34, 0.0 }
 0x118   :  { %84 = vadd.xlane.f32.xlu0 %v83_v36 }
 0x119   :  { %v113_v38 = vpop.xlane.xlu2 %112 }
 0x11a   :  { %v115_v39 = vsub.f32 %v114_v37, %v113_v38 }
 0x11c   :  { %v117_v40 = vsel %vm82_vm2, %v115_v39, 0.0 }
 0x11d   :  { %118 = vadd.xlane.f32.xlu2 %v117_v40 }
 0x18b   :  { %v85_v41 = vpop.xlane.xlu0 %84 }
 0x18c   :  { %v86_v42 = vrot.slane %v85_v41, 4 }
 0x18e   :  { %v87_v43 = vadd.f32 %v86_v42, %v85_v41 }
 0x190   :  { %v88_v44 = vrot.slane %v87_v43, 2  ;;  %v119_v45 = vpop.xlane.xlu2 %118 }
 0x191   :  { %v120_v46 = vrot.slane %v119_v45, 4 }
 0x192   :  { %v89_v47 = vadd.f32 %v88_v44, %v87_v43 }
 0x193   :  { %v121_v48 = vadd.f32 %v120_v46, %v119_v45 }
 0x194   :  { %v90_v49 = vrot.slane %v89_v47, 1 }
 0x195   :  { %v122_v50 = vrot.slane %v121_v48, 2 }
 0x196   :  { %v91_v51 = vadd.f32 %v90_v49, %v89_v47 }
 0x197   :  { %v123_v52 = vadd.f32 %v122_v50, %v121_v48 }
 0x198   :  { %165 = vpush %v91_v51 }
 0x199   :  { %v124_v53 = vrot.slane %v123_v52, 1 }
 0x19b   :  { %v125_v54 = vadd.f32 %v124_v53, %v123_v52 }
 0x19d   :  { %167 = vpush %v125_v54 }
 0x1c9   :  { %s166_s8 = spop %165 }
 0x1ca   :  { %v127_v55 = vstv %s166_s8 }
 0x1cb   :  { %128 = vst [vmem:[#allocation7] sm:$0xff] %v127_v55 }
 0x1cc   :  { %141 = dma.vmem_to_hbm [thread:$0]  %s137_s1, 128, %s139_s7, [#allocation4]  }
 0x1ce   :  { %s168_s14 = spop %167 }
 0x1cf   :  { %v129_v56 = vstv %s168_s14 }
 0x1d0   :  { %130 = vst [vmem:[#allocation8] sm:$0xff] %v129_v56 }
 0x1d1   :  { %152 = dma.vmem_to_hbm [thread:$0]  %s148_s10, 128, %s150_s13, [#allocation9]  }
 0x1d2   :  { %284 = dma.done.wait [#allocation4], 128  }
 0x1d3   :  { %285 = vsyncadd [#allocation4], 4294967168 }
 0x1d4   :  { %286 = dma.done.wait [#allocation9], 128  }
 0x1d5   :  { %287 = vsyncadd [#allocation9], 4294967168 }
 0x1d6   :  { %161 = vsyncpa [#allocation3], 1 }
 0x1d7   :  { %162 = vsyncpa [#allocation6], 1 }
 0x1d8   :  { %163 = vsyncpa [#allocation4], 1 }
 0x1d9   :  { %164 = vsyncpa [#allocation9], 1 }

</bundles_post_ra>
